<compile_context>
chip_gen: v7x
topology: tpu7x:2x2x1
jax: 0.10.0
libtpu: 0.0.40
codegen_flags: <defaults>
</compile_context>

<pallas_src>
import functools
import math

import jax
import jax.numpy as jnp
from jax import lax
from jax.experimental import pallas as pl
from jax.experimental.pallas import tpu as pltpu


def _round_up(x, m):
    return (x + m - 1) // m * m


def _pick_tile_h(h):
    """Smallest divisor of h that is >= 8 (whole image if none)."""
    if h <= 8:
        return h
    for th in range(8, h + 1):
        if h % th == 0:
            return th
    return h


def _conv2d_same_kernel(x_ref, w_ref, b_ref, o_ref, xpad_ref, *, kh_size, kw_size):
    # x_ref:    (1, H, W, Cin)            full (unpadded) image of batch n
    # w_ref:    (KH*KW*Cin, Cout_pad)     flattened HWIO weights, lane-padded
    # b_ref:    (1, Cout_pad)             float32 bias, lane-padded
    # o_ref:    (1, TILE_H, W, Cout_pad)  one H tile of the output
    # xpad_ref: (H+2*ph, W+2*pw, Cin)     VMEM scratch: zero-padded image
    hi = pl.program_id(1)
    h_img, w_img, cin = x_ref.shape[1], x_ref.shape[2], x_ref.shape[3]
    tile_h = o_ref.shape[1]
    cout_pad = o_ref.shape[3]
    ph, pw = (kh_size - 1) // 2, (kw_size - 1) // 2

    # Build the zero-padded image once per batch element (hi == 0); later H
    # tiles of the same image reuse it (H grid axis is "arbitrary").
    @pl.when(hi == 0)
    def _():
        xpad_ref[...] = jnp.zeros_like(xpad_ref)
        xpad_ref[ph:ph + h_img, pw:pw + w_img, :] = x_ref[0]

    # Row window (with halo) needed for this output tile.
    r0 = pl.multiple_of(hi * tile_h, tile_h)
    xwin = xpad_ref[pl.ds(r0, tile_h + 2 * ph), :, :]   # (tile_h+2ph, W+2pw, Cin)

    # In-kernel im2col: fold the KH*KW taps into the contraction dim so the
    # whole tile is a single MXU matmul with K = KH*KW*Cin (no 9-deep
    # accumulation chain of tiny dots).
    cols = []
    for kh in range(kh_size):
        for kw in range(kw_size):
            tap = xwin[kh:kh + tile_h, kw:kw + w_img, :]       # (tile_h, W, Cin)
            cols.append(tap.reshape(tile_h * w_img, cin))
    patch = jnp.concatenate(cols, axis=1)                      # (tile_h*W, KH*KW*Cin)

    acc = jnp.dot(patch, w_ref[...], preferred_element_type=jnp.float32)
    acc = acc + b_ref[...]                                     # (1, Cout_pad) broadcast
    o_ref[0] = acc.reshape(tile_h, w_img, cout_pad).astype(o_ref.dtype)


def conv_layer_forward(x_nchw, weight_oihw, bias, *, compute_dtype=jnp.bfloat16,
                       tile_h=None):
    """Equivalent of Conv_layer(in, out, kernel_size, bias=True).forward(x).

    compute_dtype: MXU operand dtype (bf16 by default; accumulation is f32).
    """
    n, cin, h, w = x_nchw.shape
    cout, _, kh_size, kw_size = weight_oihw.shape
    # The module's padding formula gives same-sized output only for odd kernels.
    assert kh_size % 2 == 1 and kw_size % 2 == 1, "odd kernel sizes only"
    ph, pw = (kh_size - 1) // 2, (kw_size - 1) // 2

    out_dtype = x_nchw.dtype
    cout_pad = _round_up(cout, 128)
    th = tile_h if tile_h is not None else _pick_tile_h(h)
    assert h % th == 0

    # NCHW -> NHWC (channels on the lane axis); cast operands to compute dtype.
    x = jnp.transpose(x_nchw, (0, 2, 3, 1)).astype(compute_dtype)
    # OIHW -> HWIO -> (KH*KW*Cin, Cout); pad Cout to a lane-dense multiple of
    # 128 so the kernel's output stores are unmasked.
    w2d = jnp.transpose(weight_oihw, (2, 3, 1, 0)).reshape(kh_size * kw_size * cin, cout)
    w2d = jnp.pad(w2d, ((0, 0), (0, cout_pad - cout))).astype(compute_dtype)
    b2d = jnp.pad(bias.astype(jnp.float32), (0, cout_pad - cout)).reshape(1, cout_pad)

    kernel = functools.partial(_conv2d_same_kernel, kh_size=kh_size, kw_size=kw_size)

    out_nhwc = pl.pallas_call(
        kernel,
        out_shape=jax.ShapeDtypeStruct((n, h, w, cout_pad), out_dtype),
        grid_spec=pltpu.PrefetchScalarGridSpec(
            num_scalar_prefetch=0,
            grid=(n, h // th),
            in_specs=[
                # Full image per batch element; block index is constant across
                # the H axis so it is DMA'd once per n.
                pl.BlockSpec((1, h, w, cin), lambda ni, hi: (ni, 0, 0, 0)),
                pl.BlockSpec((kh_size * kw_size * cin, cout_pad),
                             lambda ni, hi: (0, 0)),
                pl.BlockSpec((1, cout_pad), lambda ni, hi: (0, 0)),
            ],
            out_specs=pl.BlockSpec((1, th, w, cout_pad),
                                   lambda ni, hi: (ni, hi, 0, 0)),
            scratch_shapes=[
                pltpu.VMEM((h + 2 * ph, w + 2 * pw, cin), compute_dtype),
            ],
        ),
        compiler_params=pltpu.CompilerParams(
            dimension_semantics=("parallel", "arbitrary")),
    )(x, w2d, b2d)

    # Slice off the Cout lane padding and go back to NCHW.
    return jnp.transpose(out_nhwc[..., :cout], (0, 3, 1, 2))


if __name__ == "__main__":
    key = jax.random.PRNGKey(0)
    kx, kw_, kb = jax.random.split(key, 3)

    N, Cin, H, W = 2, 4, 16, 16
    Cout, KH, KW = 8, 3, 3

    x = jax.random.normal(kx, (N, Cin, H, W), dtype=jnp.float32)
    # Deterministic params (shapes match nn.Conv2d(Cin, Cout, 3, bias=True)).
    fan_in = Cin * KH * KW
    bound = 1.0 / math.sqrt(fan_in)
    weight = jax.random.uniform(kw_, (Cout, Cin, KH, KW), jnp.float32,
                                minval=-bound, maxval=bound)
    bias = jax.random.uniform(kb, (Cout,), jnp.float32,
                              minval=-bound, maxval=bound)

    # Reference: XLA conv with the same semantics as torch Conv2d(padding=1).
    ref = lax.conv_general_dilated(
        x, weight, window_strides=(1, 1), padding=((1, 1), (1, 1)),
        dimension_numbers=("NCHW", "OIHW", "NCHW")) + bias[None, :, None, None]

    # Exact (f32 operand) path.
    fwd_f32 = jax.jit(functools.partial(conv_layer_forward,
                                        compute_dtype=jnp.float32))
    out_f32 = jax.block_until_ready(fwd_f32(x, weight, bias))
    assert out_f32.shape == (N, Cout, H, W)
    assert jnp.allclose(out_f32, ref, atol=1e-4, rtol=1e-4)

    # Default bf16-operand / f32-accumulate MXU path (relaxed tolerance).
    out_bf16 = jax.block_until_ready(jax.jit(conv_layer_forward)(x, weight, bias))
    assert out_bf16.shape == (N, Cout, H, W)
    assert jnp.allclose(out_bf16, ref, atol=5e-2, rtol=5e-2)

    print("KERNEL_OK")
</pallas_src>

<mosaic_0001>
module attributes {stable_mosaic.version = 11 : i64} {
  func.func @_conv2d_same_kernel(%arg0: i32, %arg1: i32, %arg2: memref<1x16x16x4xf32, #tpu.memory_space<vmem>>, %arg3: memref<36x128xf32, #tpu.memory_space<vmem>>, %arg4: memref<1x128xf32, #tpu.memory_space<vmem>>, %arg5: memref<1x8x16x128xf32, #tpu.memory_space<vmem>>, %arg6: memref<18x18x4xf32, #tpu.memory_space<vmem>>) attributes {dimension_semantics = [#tpu.dimension_semantics<parallel>, #tpu.dimension_semantics<arbitrary>], iteration_bounds = array<i64: 2, 2>, scalar_prefetch = 0 : i64, scratch_operands = 1 : i64, tpu.core_type = #tpu.core_type<tc>, window_params = [{transform_indices = @transform_0, window_bounds = array<i64: 1, 16, 16, 4>}, {pipeline_mode = #tpu.pipeline_mode<synchronous>, transform_indices = @transform_1, window_bounds = array<i64: 36, 128>}, {pipeline_mode = #tpu.pipeline_mode<synchronous>, transform_indices = @transform_2, window_bounds = array<i64: 1, 128>}, {transform_indices = @transform_3, window_bounds = array<i64: 1, 8, 16, 128>}]} {
    %c0_i32 = arith.constant 0 : i32
    %0 = arith.cmpi eq, %arg1, %c0_i32 : i32
    %1 = arith.extui %0 : i1 to i32
    %c0_i32_0 = arith.constant 0 : i32
    %2 = arith.cmpi ne, %1, %c0_i32_0 : i32
    scf.if %2 {
      %cst_10 = arith.constant 0.000000e+00 : f32
      %35 = vector.broadcast %cst_10 : f32 to vector<18x18x4xf32>
      %c0_11 = arith.constant 0 : index
      %c0_12 = arith.constant 0 : index
      %c0_13 = arith.constant 0 : index
      %36 = vector.load %arg6[%c0_11, %c0_12, %c0_13] : memref<18x18x4xf32, #tpu.memory_space<vmem>>, vector<18x18x4xf32>
      tpu.vector_store %arg6[%c0_11, %c0_12, %c0_13], %35 {strides = array<i32>} : memref<18x18x4xf32, #tpu.memory_space<vmem>>, vector<18x18x4xf32>,
      %c0_14 = arith.constant 0 : index
      %c0_15 = arith.constant 0 : index
      %c0_16 = arith.constant 0 : index
      %c0_17 = arith.constant 0 : index
      %37 = vector.load %arg2[%c0_14, %c0_15, %c0_16, %c0_17] : memref<1x16x16x4xf32, #tpu.memory_space<vmem>>, vector<1x16x16x4xf32>
      %38 = vector.shape_cast %37 : vector<1x16x16x4xf32> to vector<16x16x4xf32>
      %c1 = arith.constant 1 : index
      %c1_18 = arith.constant 1 : index
      %c0_19 = arith.constant 0 : index
      %39 = vector.load %arg6[%c1, %c1_18, %c0_19] : memref<18x18x4xf32, #tpu.memory_space<vmem>>, vector<16x16x4xf32>
      tpu.vector_store %arg6[%c1, %c1_18, %c0_19], %38 {strides = array<i32>} : memref<18x18x4xf32, #tpu.memory_space<vmem>>, vector<16x16x4xf32>,
    } else {
    }
    %c8_i32 = arith.constant 8 : i32
    %3 = arith.muli %arg1, %c8_i32 : i32
    %4 = tpu.assume_multiple %3, 8 : i32
    %5 = arith.index_cast %4 : i32 to index
    %c0 = arith.constant 0 : index
    %c0_1 = arith.constant 0 : index
    %6 = vector.load %arg6[%5, %c0, %c0_1] : memref<18x18x4xf32, #tpu.memory_space<vmem>>, vector<10x18x4xf32>
    %7 = vector.extract_strided_slice %6 {offsets = [0, 0, 0], sizes = [8, 16, 4], strides = [1, 1, 1]} : vector<10x18x4xf32> to vector<8x16x4xf32>
    %8 = vector.shape_cast %7 : vector<8x16x4xf32> to vector<128x4xf32>
    %9 = vector.extract_strided_slice %6 {offsets = [0, 1, 0], sizes = [8, 16, 4], strides = [1, 1, 1]} : vector<10x18x4xf32> to vector<8x16x4xf32>
    %10 = vector.shape_cast %9 : vector<8x16x4xf32> to vector<128x4xf32>
    %11 = vector.extract_strided_slice %6 {offsets = [0, 2, 0], sizes = [8, 16, 4], strides = [1, 1, 1]} : vector<10x18x4xf32> to vector<8x16x4xf32>
    %12 = vector.shape_cast %11 : vector<8x16x4xf32> to vector<128x4xf32>
    %13 = vector.extract_strided_slice %6 {offsets = [1, 0, 0], sizes = [8, 16, 4], strides = [1, 1, 1]} : vector<10x18x4xf32> to vector<8x16x4xf32>
    %14 = vector.shape_cast %13 : vector<8x16x4xf32> to vector<128x4xf32>
    %15 = vector.extract_strided_slice %6 {offsets = [1, 1, 0], sizes = [8, 16, 4], strides = [1, 1, 1]} : vector<10x18x4xf32> to vector<8x16x4xf32>
    %16 = vector.shape_cast %15 : vector<8x16x4xf32> to vector<128x4xf32>
    %17 = vector.extract_strided_slice %6 {offsets = [1, 2, 0], sizes = [8, 16, 4], strides = [1, 1, 1]} : vector<10x18x4xf32> to vector<8x16x4xf32>
    %18 = vector.shape_cast %17 : vector<8x16x4xf32> to vector<128x4xf32>
    %19 = vector.extract_strided_slice %6 {offsets = [2, 0, 0], sizes = [8, 16, 4], strides = [1, 1, 1]} : vector<10x18x4xf32> to vector<8x16x4xf32>
    %20 = vector.shape_cast %19 : vector<8x16x4xf32> to vector<128x4xf32>
    %21 = vector.extract_strided_slice %6 {offsets = [2, 1, 0], sizes = [8, 16, 4], strides = [1, 1, 1]} : vector<10x18x4xf32> to vector<8x16x4xf32>
    %22 = vector.shape_cast %21 : vector<8x16x4xf32> to vector<128x4xf32>
    %23 = vector.extract_strided_slice %6 {offsets = [2, 2, 0], sizes = [8, 16, 4], strides = [1, 1, 1]} : vector<10x18x4xf32> to vector<8x16x4xf32>
    %24 = vector.shape_cast %23 : vector<8x16x4xf32> to vector<128x4xf32>
    %25 = tpu.concatenate %8, %10, %12, %14, %16, %18, %20, %22, %24 in 1 : vector<128x4xf32>, vector<128x4xf32>, vector<128x4xf32>, vector<128x4xf32>, vector<128x4xf32>, vector<128x4xf32>, vector<128x4xf32>, vector<128x4xf32>, vector<128x4xf32> -> vector<128x36xf32>
    %c0_2 = arith.constant 0 : index
    %c0_3 = arith.constant 0 : index
    %26 = vector.load %arg3[%c0_2, %c0_3] : memref<36x128xf32, #tpu.memory_space<vmem>>, vector<36x128xf32>
    %cst = arith.constant dense<0.000000e+00> : vector<128x128xf32>
    %27 = tpu.matmul %25, %26, %cst {dimension_numbers = #tpu.dot_dimension_numbers<[1], [0], [0], [1], [0, 0, 1, 1], [], []>} : vector<128x36xf32>, vector<36x128xf32>, vector<128x128xf32> -> vector<128x128xf32>
    %c0_4 = arith.constant 0 : index
    %c0_5 = arith.constant 0 : index
    %28 = vector.load %arg4[%c0_4, %c0_5] : memref<1x128xf32, #tpu.memory_space<vmem>>, vector<1x128xf32>
    %29 = vector.broadcast %28 : vector<1x128xf32> to vector<128x128xf32>
    %30 = arith.addf %27, %29 : vector<128x128xf32>
    %31 = vector.shape_cast %30 : vector<128x128xf32> to vector<8x16x128xf32>
    %c0_6 = arith.constant 0 : index
    %c0_7 = arith.constant 0 : index
    %c0_8 = arith.constant 0 : index
    %c0_9 = arith.constant 0 : index
    %32 = vector.load %arg5[%c0_6, %c0_7, %c0_8, %c0_9] : memref<1x8x16x128xf32, #tpu.memory_space<vmem>>, vector<1x8x16x128xf32>
    %33 = vector.shape_cast %32 : vector<1x8x16x128xf32> to vector<8x16x128xf32>
    %34 = vector.shape_cast %31 : vector<8x16x128xf32> to vector<1x8x16x128xf32>
    tpu.vector_store %arg5[%c0_6, %c0_7, %c0_8, %c0_9], %34 {strides = array<i32>} : memref<1x8x16x128xf32, #tpu.memory_space<vmem>>, vector<1x8x16x128xf32>,
    return
  }
  func.func @transform_0(%arg0: i32, %arg1: i32) -> (i32, i32, i32, i32) {
    %c0_i32 = arith.constant 0 : i32
    %c0_i32_0 = arith.constant 0 : i32
    %c0_i32_1 = arith.constant 0 : i32
    %c0_i32_2 = arith.constant 0 : i32
    return %arg0, %c0_i32, %c0_i32_0, %c0_i32_1 : i32, i32, i32, i32
  }
  func.func @transform_1(%arg0: i32, %arg1: i32) -> (i32, i32) {
    %c0_i32 = arith.constant 0 : i32
    %c0_i32_0 = arith.constant 0 : i32
    %c0_i32_1 = arith.constant 0 : i32
    return %c0_i32, %c0_i32_0 : i32, i32
  }
  func.func @transform_2(%arg0: i32, %arg1: i32) -> (i32, i32) {
    %c0_i32 = arith.constant 0 : i32
    %c0_i32_0 = arith.constant 0 : i32
    %c0_i32_1 = arith.constant 0 : i32
    return %c0_i32, %c0_i32_0 : i32, i32
  }
  func.func @transform_3(%arg0: i32, %arg1: i32) -> (i32, i32, i32, i32) {
    %c0_i32 = arith.constant 0 : i32
    %c0_i32_0 = arith.constant 0 : i32
    %c0_i32_1 = arith.constant 0 : i32
    return %arg0, %arg1, %c0_i32, %c0_i32_0 : i32, i32, i32, i32
  }
}

</mosaic_0001>

<bundles_post_ra>
// kernel: conv_layer_forward.1
= control target key start
LH: loop header
LB: loop body
LE: loop exit
PB: predicated region body
PF: predicated region fallthrough
CT: control target
= control target key end

     0   :  { %s1546_s12 = smov 0   ;;  %s1548_s13 = smov 0   ;;  %s2386_s0 = inlined_call_operand.vmem [shape: f32[2,16,16,4], index: 0, kind: input, shape index: {}]   ;;  %s2387_s1 = inlined_call_operand.vmem [shape: f32[36,128], index: 1, kind: input, shape index: {}]   ;;  %s2388_s2 = inlined_call_operand.vmem [shape: f32[1,128], index: 2, kind: input, shape index: {}]   ;;  %s2389_s3 = inlined_call_operand.vmem [shape: f32[2,16,16,128], index: 3, kind: output, shape index: {}]  }
   0x1   :  { %s1550_s14 = smov 0   ;;  %s1552_s15 = smov 0  }
   0x2   :  { %s1554_s16 = smov 0  }
   0x3 LB: > { %s22_s17 = sadd.s32 1, %s1507_s14  ;;  %s25_s18 = sadd.s32 1, %s1511_s15  ;;  %s1515_s16 = sphi %s1554_s16, %s13_s16   ;;  %s1511_s15 = sphi %s1552_s15, %s2420_s15   ;;  %s1507_s14 = sphi %s1550_s14, %s2419_s14   ;;  %s1503_s13 = sphi %s1548_s13, %s2418_s13   ;;  %s1499_s12 = sphi %s1546_s12, %s2417_s12  }
   0x4   : > { %p23_p0 = scmp.ge.s32.totalorder %s22_s17, 2  ;;  %p1328_p1 = scmp.ge.s32.totalorder %s1515_s16, 1 }
   0x5   : > { %p151_p2 = scmp.lt.s32.totalorder %s1515_s16, 5 }
   0x6   : > { %s2422_s17 = smov (%p23_p0, %s22_s17), 0  ;;  %s2424_s18 = smov (!%p23_p0, %s25_s18), %s1511_s15 }
   0x7   : > { %p152_p3 = pnand %p1328_p1, %p151_p2  ;;  %p27_p4 = scmp.ge.s32.totalorder %s2424_s18, 2 }
   0x9   : > { %s2426_s18 = smov (%p27_p4, %s2424_s18), 0  ;;  %155 = sbr.rel (%p152_p3) target bundleno = 658 (0x292), region = 32 }
  0x10   : > { %p180_p5 = scmp.lt.s32.totalorder %s1503_s13, 1  ;;  %s1331_s19 = sshll.u32 %s1499_s12, 3 }
  0x11   : > { %p188_p6 = scmp.lt.s32.totalorder %s1331_s19, 15  ;;  %p1335_p7 = scmp.ne.s32.totalorder %s1499_s12, 0 }
  0x12   : > { %s2428_s13 = smov (!%p180_p5, %s1503_s13), 1  ;;  %vm200_vm0 = vcmask (!%p1335_p7), 31744   ;;  %vm203_vm1 = vcmask (!%p1335_p7), 25600   ;;  %v1517_v3 = vmov (!%p1335_p7), 0.0  }
  0x13   : > { %s2430_s19 = smov (!%p188_p6, %s1331_s19), 15  ;;  %s1358_s20 = sshll.u32 %s2428_s13, 8  ;;  %205 = vst.msk [vmem:[#allocation2 + $0x18] sm:$0xff] (!%p1335_p7), %vm200_vm0, %v1517_v3  ;;  %201 = vst.msk [vmem:[#allocation2] sm:$0xff] (!%p1335_p7), %vm200_vm0, %v1517_v3 }
  0x14   : > { %s1333_s21 = sshll.u32 %s2428_s13, 5  ;;  %s1582_s24 = scalar_lea.vmem %s2386_s0, %s1358_s20  ;;  %202 = vst.msk [vmem:[#allocation2 + $0x8] sm:$0xff] (!%p1335_p7), %vm200_vm0, %v1517_v3  ;;  %206 = vst.msk [vmem:[#allocation2 + $0x20] sm:$0xff] (!%p1335_p7), %vm200_vm0, %v1517_v3 }
  0x15   : > { %s1332_s25 = sshll.u32 %s2430_s19, 1  ;;  %199 = sbr.rel (%p1335_p7) target bundleno = 63 (0x3f), region = 36  ;;  %v256_v0 = vld [vmem:[%s1582_s24] sm:$0xff] (!%p1335_p7)  ;;  %v257_v1 = vld [vmem:[%s1582_s24 + $0x8] sm:$0xff] (!%p1335_p7)  ;;  %v258_v2 = vld [vmem:[%s1582_s24 + $0x10] sm:$0xff] (!%p1335_p7)  ;;  %208 = vst.msk [vmem:[#allocation2 + $0x30] sm:$0xff] (!%p1335_p7), %vm200_vm0, %v1517_v3 }
  0x16   : > { %s192_s26 = sadd.s32 %s1333_s21, %s1332_s25  ;;  %209 = vst.msk [vmem:[#allocation2 + $0x38] sm:$0xff] (!%p1335_p7), %vm200_vm0, %v1517_v3  ;;  %211 = vst.msk [vmem:[#allocation2 + $0x48] sm:$0xff] (!%p1335_p7), %vm200_vm0, %v1517_v3  ;;  %v259_v4 = vld [vmem:[%s1582_s24 + $0x18] sm:$0xff] (!%p1335_p7)  ;;  %v260_v5 = vld [vmem:[%s1582_s24 + $0x20] sm:$0xff] (!%p1335_p7) }
  0x17   : > { %s1334_s27 = sshll.u32 %s192_s26, 3  ;;  %212 = vst.msk [vmem:[#allocation2 + $0x50] sm:$0xff] (!%p1335_p7), %vm200_vm0, %v1517_v3  ;;  %214 = vst.msk [vmem:[#allocation2 + $0x60] sm:$0xff] (!%p1335_p7), %vm200_vm0, %v1517_v3  ;;  %v261_v6 = vld [vmem:[%s1582_s24 + $0x28] sm:$0xff] (!%p1335_p7)  ;;  %v262_v7 = vld [vmem:[%s1582_s24 + $0x30] sm:$0xff] (!%p1335_p7) }
  0x18   : > { %s1587_s30 = scalar_lea.vmem %s2389_s3, %s1334_s27  ;;  %215 = vst.msk [vmem:[#allocation2 + $0x68] sm:$0xff] (!%p1335_p7), %vm200_vm0, %v1517_v3  ;;  %217 = vst.msk [vmem:[#allocation2 + $0x78] sm:$0xff] (!%p1335_p7), %vm200_vm0, %v1517_v3  ;;  %v263_v8 = vld [vmem:[%s1582_s24 + $0x38] sm:$0xff] (!%p1335_p7)  ;;  %v264_v9 = vld [vmem:[%s1582_s24 + $0x40] sm:$0xff] (!%p1335_p7) }
  0x19   : > { %218 = vst.msk [vmem:[#allocation2 + $0x80] sm:$0xff] (!%p1335_p7), %vm200_vm0, %v1517_v3  ;;  %220 = vst.msk [vmem:[#allocation2 + $0x90] sm:$0xff] (!%p1335_p7), %vm200_vm0, %v1517_v3  ;;  %v265_v10 = vld [vmem:[%s1582_s24 + $0x48] sm:$0xff] (!%p1335_p7)  ;;  %v266_v11 = vld [vmem:[%s1582_s24 + $0x50] sm:$0xff] (!%p1335_p7) }
  0x1a   : > { %221 = vst.msk [vmem:[#allocation2 + $0x98] sm:$0xff] (!%p1335_p7), %vm200_vm0, %v1517_v3  ;;  %223 = vst.msk [vmem:[#allocation2 + $0xa8] sm:$0xff] (!%p1335_p7), %vm200_vm0, %v1517_v3  ;;  %v267_v12 = vld [vmem:[%s1582_s24 + $0x58] sm:$0xff] (!%p1335_p7)  ;;  %v268_v13 = vld [vmem:[%s1582_s24 + $0x60] sm:$0xff] (!%p1335_p7) }
  0x1b   : > { %224 = vst.msk [vmem:[#allocation2 + $0xb0] sm:$0xff] (!%p1335_p7), %vm200_vm0, %v1517_v3  ;;  %226 = vst.msk [vmem:[#allocation2 + $0xc0] sm:$0xff] (!%p1335_p7), %vm200_vm0, %v1517_v3  ;;  %v269_v14 = vld [vmem:[%s1582_s24 + $0x68] sm:$0xff] (!%p1335_p7)  ;;  %v270_v15 = vld [vmem:[%s1582_s24 + $0x70] sm:$0xff] (!%p1335_p7) }
  0x1c   : > { %227 = vst.msk [vmem:[#allocation2 + $0xc8] sm:$0xff] %vm200_vm0, %v1517_v3  ;;  %229 = vst.msk [vmem:[#allocation2 + $0xd8] sm:$0xff] %vm200_vm0, %v1517_v3  ;;  %v271_v16 = vld [vmem:[%s1582_s24 + $0x78] sm:$0xff]  ;;  %v272_v17 = vld [vmem:[%s1582_s24 + $0x80] sm:$0xff] }
  0x1d   : > { %230 = vst.msk [vmem:[#allocation2 + $0xe0] sm:$0xff] %vm200_vm0, %v1517_v3  ;;  %232 = vst.msk [vmem:[#allocation2 + $0xf0] sm:$0xff] %vm200_vm0, %v1517_v3  ;;  %v273_v18 = vld [vmem:[%s1582_s24 + $0x88] sm:$0xff]  ;;  %v274_v19 = vld [vmem:[%s1582_s24 + $0x90] sm:$0xff] }
  0x1e   : > { %233 = vst.msk [vmem:[#allocation2 + $0xf8] sm:$0xff] %vm200_vm0, %v1517_v3  ;;  %235 = vst.msk [vmem:[#allocation2 + $0x108] sm:$0xff] %vm200_vm0, %v1517_v3  ;;  %v275_v20 = vld [vmem:[%s1582_s24 + $0x98] sm:$0xff]  ;;  %v276_v21 = vld [vmem:[%s1582_s24 + $0xa0] sm:$0xff] }
  0x1f   : > { %236 = vst.msk [vmem:[#allocation2 + $0x110] sm:$0xff] %vm200_vm0, %v1517_v3  ;;  %238 = vst.msk [vmem:[#allocation2 + $0x120] sm:$0xff] %vm200_vm0, %v1517_v3  ;;  %v277_v22 = vld [vmem:[%s1582_s24 + $0xa8] sm:$0xff]  ;;  %v278_v23 = vld [vmem:[%s1582_s24 + $0xb0] sm:$0xff] }
  0x20   : > { %239 = vst.msk [vmem:[#allocation2 + $0x128] sm:$0xff] %vm200_vm0, %v1517_v3  ;;  %241 = vst.msk [vmem:[#allocation2 + $0x138] sm:$0xff] %vm200_vm0, %v1517_v3  ;;  %v279_v24 = vld [vmem:[%s1582_s24 + $0xb8] sm:$0xff]  ;;  %v280_v25 = vld [vmem:[%s1582_s24 + $0xc0] sm:$0xff] }
  0x21   : > { %242 = vst.msk [vmem:[#allocation2 + $0x140] sm:$0xff] %vm200_vm0, %v1517_v3  ;;  %244 = vst.msk [vmem:[#allocation2 + $0x150] sm:$0xff] %vm200_vm0, %v1517_v3  ;;  %v281_v26 = vld [vmem:[%s1582_s24 + $0xc8] sm:$0xff]  ;;  %v282_v27 = vld [vmem:[%s1582_s24 + $0xd0] sm:$0xff] }
  0x22   : > { %245 = vst.msk [vmem:[#allocation2 + $0x158] sm:$0xff] %vm200_vm0, %v1517_v3  ;;  %247 = vst.msk [vmem:[#allocation2 + $0x168] sm:$0xff] %vm200_vm0, %v1517_v3  ;;  %v283_v28 = vld [vmem:[%s1582_s24 + $0xd8] sm:$0xff]  ;;  %v284_v29 = vld [vmem:[%s1582_s24 + $0xe0] sm:$0xff] }
  0x23   : > { %248 = vst.msk [vmem:[#allocation2 + $0x170] sm:$0xff] %vm200_vm0, %v1517_v3  ;;  %250 = vst.msk [vmem:[#allocation2 + $0x180] sm:$0xff] %vm200_vm0, %v1517_v3  ;;  %v285_v30 = vld [vmem:[%s1582_s24 + $0xe8] sm:$0xff]  ;;  %v286_v31 = vld [vmem:[%s1582_s24 + $0xf0] sm:$0xff] }
  0x24   : > { %251 = vst.msk [vmem:[#allocation2 + $0x188] sm:$0xff] %vm200_vm0, %v1517_v3  ;;  %253 = vst.msk [vmem:[#allocation2 + $0x198] sm:$0xff] %vm200_vm0, %v1517_v3  ;;  %v287_v32 = vld [vmem:[%s1582_s24 + $0xf8] sm:$0xff] }
  0x25   : > { %254 = vst.msk [vmem:[#allocation2 + $0x1a0] sm:$0xff] %vm200_vm0, %v1517_v3  ;;  %289 = vst.msk [vmem:[#allocation2 + $0x19] sm:$0xff] %vm200_vm0, %v256_v0 }
  0x26   : > { %207 = vst.msk [vmem:[#allocation2 + $0x28] sm:$0x3] %vm203_vm1, %v1517_v3  ;;  %204 = vst.msk [vmem:[#allocation2 + $0x10] sm:$0x3] %vm203_vm1, %v1517_v3 }
  0x27   : > { %210 = vst.msk [vmem:[#allocation2 + $0x40] sm:$0x3] %vm203_vm1, %v1517_v3  ;;  %213 = vst.msk [vmem:[#allocation2 + $0x58] sm:$0x3] %vm203_vm1, %v1517_v3 }
  0x28   : > { %216 = vst.msk [vmem:[#allocation2 + $0x70] sm:$0x3] %vm203_vm1, %v1517_v3  ;;  %219 = vst.msk [vmem:[#allocation2 + $0x88] sm:$0x3] %vm203_vm1, %v1517_v3 }
  0x29   : > { %222 = vst.msk [vmem:[#allocation2 + $0xa0] sm:$0x3] %vm203_vm1, %v1517_v3  ;;  %225 = vst.msk [vmem:[#allocation2 + $0xb8] sm:$0x3] %vm203_vm1, %v1517_v3 }
  0x2a   : > { %228 = vst.msk [vmem:[#allocation2 + $0xd0] sm:$0x3] %vm203_vm1, %v1517_v3  ;;  %231 = vst.msk [vmem:[#allocation2 + $0xe8] sm:$0x3] %vm203_vm1, %v1517_v3 }
  0x2b   : > { %234 = vst.msk [vmem:[#allocation2 + $0x100] sm:$0x3] %vm203_vm1, %v1517_v3  ;;  %237 = vst.msk [vmem:[#allocation2 + $0x118] sm:$0x3] %vm203_vm1, %v1517_v3 }
  0x2c   : > { %240 = vst.msk [vmem:[#allocation2 + $0x130] sm:$0x3] %vm203_vm1, %v1517_v3  ;;  %243 = vst.msk [vmem:[#allocation2 + $0x148] sm:$0x3] %vm203_vm1, %v1517_v3 }
  0x2d   : > { %246 = vst.msk [vmem:[#allocation2 + $0x160] sm:$0x3] %vm203_vm1, %v1517_v3  ;;  %249 = vst.msk [vmem:[#allocation2 + $0x178] sm:$0x3] %vm203_vm1, %v1517_v3 }
  0x2e   : > { %252 = vst.msk [vmem:[#allocation2 + $0x190] sm:$0x3] %vm203_vm1, %v1517_v3  ;;  %255 = vst.msk [vmem:[#allocation2 + $0x1a8] sm:$0x3] %vm203_vm1, %v1517_v3 }
  0x2f   : > { %290 = vst.msk [vmem:[#allocation2 + $0x21] sm:$0xff] %vm200_vm0, %v257_v1  ;;  %291 = vst.msk [vmem:[#allocation2 + $0x31] sm:$0xff] %vm200_vm0, %v258_v2 }
  0x30   : > { %292 = vst.msk [vmem:[#allocation2 + $0x39] sm:$0xff] %vm200_vm0, %v259_v4  ;;  %293 = vst.msk [vmem:[#allocation2 + $0x49] sm:$0xff] %vm200_vm0, %v260_v5 }
  0x31   : > { %294 = vst.msk [vmem:[#allocation2 + $0x51] sm:$0xff] %vm200_vm0, %v261_v6  ;;  %295 = vst.msk [vmem:[#allocation2 + $0x61] sm:$0xff] %vm200_vm0, %v262_v7 }
  0x32   : > { %296 = vst.msk [vmem:[#allocation2 + $0x69] sm:$0xff] %vm200_vm0, %v263_v8  ;;  %297 = vst.msk [vmem:[#allocation2 + $0x79] sm:$0xff] %vm200_vm0, %v264_v9 }
  0x33   : > { %298 = vst.msk [vmem:[#allocation2 + $0x81] sm:$0xff] %vm200_vm0, %v265_v10  ;;  %299 = vst.msk [vmem:[#allocation2 + $0x91] sm:$0xff] %vm200_vm0, %v266_v11 }
  0x34   : > { %300 = vst.msk [vmem:[#allocation2 + $0x99] sm:$0xff] %vm200_vm0, %v267_v12  ;;  %301 = vst.msk [vmem:[#allocation2 + $0xa9] sm:$0xff] %vm200_vm0, %v268_v13 }
  0x35   : > { %302 = vst.msk [vmem:[#allocation2 + $0xb1] sm:$0xff] %vm200_vm0, %v269_v14  ;;  %303 = vst.msk [vmem:[#allocation2 + $0xc1] sm:$0xff] %vm200_vm0, %v270_v15 }
  0x36   : > { %304 = vst.msk [vmem:[#allocation2 + $0xc9] sm:$0xff] %vm200_vm0, %v271_v16  ;;  %305 = vst.msk [vmem:[#allocation2 + $0xd9] sm:$0xff] %vm200_vm0, %v272_v17 }
  0x37   : > { %306 = vst.msk [vmem:[#allocation2 + $0xe1] sm:$0xff] %vm200_vm0, %v273_v18  ;;  %307 = vst.msk [vmem:[#allocation2 + $0xf1] sm:$0xff] %vm200_vm0, %v274_v19 }
  0x38   : > { %308 = vst.msk [vmem:[#allocation2 + $0xf9] sm:$0xff] %vm200_vm0, %v275_v20  ;;  %309 = vst.msk [vmem:[#allocation2 + $0x109] sm:$0xff] %vm200_vm0, %v276_v21 }
  0x39   : > { %310 = vst.msk [vmem:[#allocation2 + $0x111] sm:$0xff] %vm200_vm0, %v277_v22  ;;  %311 = vst.msk [vmem:[#allocation2 + $0x121] sm:$0xff] %vm200_vm0, %v278_v23 }
  0x3a   : > { %312 = vst.msk [vmem:[#allocation2 + $0x129] sm:$0xff] %vm200_vm0, %v279_v24  ;;  %313 = vst.msk [vmem:[#allocation2 + $0x139] sm:$0xff] %vm200_vm0, %v280_v25 }
  0x3b   : > { %314 = vst.msk [vmem:[#allocation2 + $0x141] sm:$0xff] %vm200_vm0, %v281_v26  ;;  %315 = vst.msk [vmem:[#allocation2 + $0x151] sm:$0xff] %vm200_vm0, %v282_v27 }
  0x3c   : > { %316 = vst.msk [vmem:[#allocation2 + $0x159] sm:$0xff] %vm200_vm0, %v283_v28  ;;  %317 = vst.msk [vmem:[#allocation2 + $0x169] sm:$0xff] %vm200_vm0, %v284_v29 }
  0x3d   : > { %318 = vst.msk [vmem:[#allocation2 + $0x171] sm:$0xff] %vm200_vm0, %v285_v30  ;;  %319 = vst.msk [vmem:[#allocation2 + $0x181] sm:$0xff] %vm200_vm0, %v286_v31 }
  0x3e   : > { %320 = vst.msk [vmem:[#allocation2 + $0x189] sm:$0xff] %vm200_vm0, %v287_v32 }
  0x3f PF: > { %s1337_s4 = smul.u32 192, %s1499_s12  ;;  %vm378_vm2 = vcmask 1046528   ;;  %s1518_s6 = smov 4   ;;  %vm419_vm3 = vcmask 1045504   ;;  %vm1067_vm4 = vcmask 1043456   ;;  %vm870_vm5 = vcmask 31744  }
  0x40   : > { %s1519_s7 = smov 8   ;;  %s1520_s8 = smov 12   ;;  %vm887_vm6 = vcmask 64512   ;;  %vm904_vm7 = vcmask 97280   ;;  %vm921_vm8 = vcmask 130048   ;;  %vm938_vm9 = vcmask 162816  }
  0x41   : > { %s1709_s5 = scalar_lea.vmem [#allocation2], %s1337_s4  ;;  %s1521_s9 = smov 16   ;;  %vm955_vm10 = vcmask 195584   ;;  %vm972_vm11 = vcmask 228352   ;;  %vm989_vm12 = vcmask 261120   ;;  %vm1018_vm13 = vcmask 293888  }
  0x42   : > { %s1522_s10 = smov 20   ;;  %s1523_s11 = smov 24  }
  0x43   : > { %s1524_s12 = smov 28   ;;  %s1525_s26 = smov 32  }
  0x45   : > { %v1712_v33 = vld [vmem:[%s1709_s5 + $0x8] sm:$0xff]  ;;  %v326_v34 = vld [vmem:[%s1709_s5 + $0x10] sm:$0x3]  ;;  %v1716_v35 = vld [vmem:[%s1709_s5] sm:$0xff] }
  0x46   : > { %v380_v36 = vrot.slane %v1712_v33, 1  ;;  %v382_v37 = vrot.slane %v326_v34, 1  ;;  %v379_v38 = vrot.slane %v1716_v35, 1  ;;  %v1721_v39 = vld [vmem:[%s1709_s5 + $0x68] sm:$0xff]  ;;  %v338_v40 = vld [vmem:[%s1709_s5 + $0x70] sm:$0x3] }
  0x47   : > { %v400_v41 = vrot.slane %v1721_v39, 1  ;;  %v402_v42 = vrot.slane %v338_v40, 1  ;;  %v1726_v43 = vld [vmem:[%s1709_s5 + $0x60] sm:$0xff]  ;;  %v441_v47 = vrot.slane %v1721_v39, 2  ;;  %v420_v48 = vrot.slane %v1716_v35, 2  ;;  %v1762_v59 = vld [vmem:[%s1709_s5 + $0x78] sm:$0xff] }
  0x48   : > { %v383_v44 = vsel %vm378_vm2, %v380_v36, %v382_v37  ;;  %v381_v45 = vsel %vm378_vm2, %v379_v38, %v380_v36  ;;  %v399_v46 = vrot.slane %v1726_v43, 1  ;;  %v440_v51 = vrot.slane %v1726_v43, 2  ;;  %v1765_v60 = vld [vmem:[%s1709_s5 + $0x18] sm:$0xff]  ;;  %v1768_v61 = vld [vmem:[%s1709_s5 + $0x80] sm:$0xff]  ;;  %v341_v5 = vld [vmem:[%s1709_s5 + $0x88] sm:$0x3] }
  0x49   : > { %488 = vrot.lane.b32.xlu1 %v383_v44, %s1518_s6  ;;  %486 = vrot.lane.b32.xlu0 %v381_v45, %s1518_s6  ;;  %v1736_v49 = vsel %vm378_vm2, %v400_v41, %v402_v42  ;;  %v421_v52 = vrot.slane %v1712_v33, 2  ;;  %v443_v55 = vrot.slane %v338_v40, 2  ;;  %v423_v56 = vrot.slane %v326_v34, 2  ;;  %v1771_v62 = vld [vmem:[%s1709_s5 + $0x20] sm:$0xff]  ;;  %v329_v6 = vld [vmem:[%s1709_s5 + $0x28] sm:$0x3] }
  0x4a   : > { %v1739_v50 = vsel %vm378_vm2, %v399_v46, %v400_v41  ;;  %v1748_v53 = vsel %vm419_vm3, %v440_v51, %v441_v47  ;;  %v404_v63 = vrot.slane %v1762_v59, 1  ;;  %v405_v0 = vrot.slane %v1768_v61, 1  ;;  %v1829_v21 = vld [vmem:[%s1709_s5 + $0x90] sm:$0xff]  ;;  %v1842_v23 = vld [vmem:[%s1709_s5 + $0x98] sm:$0xff]  ;;  %v344_v31 = vld [vmem:[%s1709_s5 + $0xa0] sm:$0x3] }
  0x4b   : > { %v422_v54 = vsel %vm419_vm3, %v420_v48, %v421_v52  ;;  %v1755_v57 = vsel %vm419_vm3, %v441_v47, %v443_v55  ;;  %v424_v58 = vsel %vm419_vm3, %v421_v52, %v423_v56  ;;  %v384_v1 = vrot.slane %v1765_v60, 1  ;;  %v1832_v22 = vld [vmem:[%s1709_s5 + $0x30] sm:$0xff]  ;;  %v1845_v24 = vld [vmem:[%s1709_s5 + $0x38] sm:$0xff]  ;;  %v332_v32 = vld [vmem:[%s1709_s5 + $0x40] sm:$0x3] }
  0x4c   : > { %v385_v2 = vrot.slane %v1771_v62, 1  ;;  %v1786_v3 = vsel %vm378_vm2, %v404_v63, %v405_v0  ;;  %v407_v7 = vrot.slane %v341_v5, 1  ;;  %v387_v8 = vrot.slane %v329_v6, 1  ;;  %2403 = vst [vmem:[#allocation7_spill] sm:$0xff] %v1845_v24  ;;  %v1006_v41 = vld [vmem:[%s2387_s1] sm:$0xff]  ;;  %v1007_v42 = vld [vmem:[%s2387_s1 + $0x8] sm:$0xff] }
  0x4d   : > { %504 = vrot.lane.b32.xlu1 %v1736_v49, %s1518_s6  ;;  %502 = vrot.lane.b32.xlu0 %v1739_v50, %s1518_s6  ;;  %2399 = vst [vmem:[#allocation3_spill] sm:$0xff] %v1786_v3  ;;  %v445_v9 = vrot.slane %v1762_v59, 2  ;;  %v446_v10 = vrot.slane %v1768_v61, 2  ;;  %v425_v13 = vrot.slane %v1765_v60, 2  ;;  %v426_v14 = vrot.slane %v1771_v62, 2  ;;  %v1008_v48 = vld [vmem:[%s2387_s1 + $0x10] sm:$0xff] }
  0x4e   : > { %v386_v4 = vsel %vm378_vm2, %v384_v1, %v385_v2  ;;  %v1800_v11 = vsel %vm378_vm2, %v405_v0, %v407_v7  ;;  %v388_v12 = vsel %vm378_vm2, %v385_v2, %v387_v8  ;;  %v448_v17 = vrot.slane %v341_v5, 2  ;;  %v1009_v51 = vld [vmem:[%s2387_s1 + $0x18] sm:$0xff]  ;;  %v1010_v56 = vld [vmem:[%s2387_s1 + $0x20] sm:$0xf]  ;;  %v1915_v2 = vld [vmem:[%s1709_s5 + $0xa8] sm:$0xff] }
  0x4f   : > { %2400 = vst [vmem:[#allocation4_spill] sm:$0xff] %v1800_v11  ;;  %v1809_v15 = vsel %vm419_vm3, %v445_v9, %v446_v10  ;;  %v427_v16 = vsel %vm419_vm3, %v425_v13, %v426_v14  ;;  %v428_v18 = vrot.slane %v329_v6, 2  ;;  %v409_v25 = vrot.slane %v1829_v21, 1  ;;  %2404 = vst [vmem:[#allocation8_spill] sm:$0xff] %v1915_v2  ;;  %v1942_v13 = vld [vmem:[%s1709_s5 + $0x50] sm:$0xff] }
  0x50   : > { %2401 = vst [vmem:[#allocation5_spill] sm:$0xff] %v1809_v15  ;;  %v1822_v19 = vsel %vm419_vm3, %v446_v10, %v448_v17  ;;  %v410_v26 = vrot.slane %v1842_v23, 1  ;;  %v389_v27 = vrot.slane %v1832_v22, 1  ;;  %v390_v28 = vrot.slane %v1845_v24, 1  ;;  %2407 = vst [vmem:[#allocation11_spill] sm:$0xff] %v1942_v13 }
  0x51   : > { %550 = vrot.lane.b32.xlu1 %v1748_v53, %s1519_s7  ;;  %534 = vrot.lane.b32.xlu0 %v422_v54, %s1519_s7  ;;  %2402 = vst [vmem:[#allocation6_spill] sm:$0xff] %v1822_v19  ;;  %v429_v20 = vsel %vm419_vm3, %v426_v14, %v428_v18  ;;  %v412_v34 = vrot.slane %v344_v31, 1  ;;  %v392_v36 = vrot.slane %v332_v32, 1  ;;  %v450_v37 = vrot.slane %v1829_v21, 2 }
  0x52   : > { %v411_v29 = vsel %vm378_vm2, %v409_v25, %v410_v26  ;;  %v391_v30 = vsel %vm378_vm2, %v389_v27, %v390_v28  ;;  %v451_v38 = vrot.slane %v1842_v23, 2  ;;  %v430_v40 = vrot.slane %v1832_v22, 2 }
  0x53   : > { %v413_v44 = vsel %vm378_vm2, %v410_v26, %v412_v34  ;;  %v393_v45 = vsel %vm378_vm2, %v390_v28, %v392_v36  ;;  %v431_v46 = vrot.slane %v1845_v24, 2  ;;  %v1414_v47 = vpack.c.bf16 %v1007_v42, %v1006_v41 }
  0x54   : > { %v452_v52 = vsel %vm419_vm3, %v450_v37, %v451_v38  ;;  %v1418_v55 = vpack.c.bf16 %v1009_v51, %v1008_v48  ;;  %v433_v63 = vrot.slane %v332_v32, 2  ;;  %v414_v14 = vrot.slane %v1915_v2, 1 }
  0x55   : > { %552 = vrot.lane.b32.xlu1 %v1755_v57, %s1519_s7  ;;  %536 = vrot.lane.b32.xlu0 %v424_v58, %s1519_s7  ;;  %v432_v54 = vsel %vm419_vm3, %v430_v40, %v431_v46  ;;  %v453_v58 = vrot.slane %v344_v31, 2  ;;  %v395_v18 = vrot.slane %v1942_v13, 1  ;;  %v335_v31 = vld [vmem:[%s1709_s5 + $0x58] sm:$0x3] }
  0x56   : > { %1415 = vmatprep.subr.bf16.mxu0 %v1414_v47  ;;  %1422 = vmatprep.subr.bf16.mxu1 %v1414_v47  ;;  %v434_v1 = vsel %vm419_vm3, %v431_v46, %v433_v63  ;;  %v397_v37 = vrot.slane %v335_v31, 1 }
  0x57   : > { %1417 = vmatpush3.bf16.msra.mxu0 %v1414_v47  ;;  %1425 = vmatpush3.bf16.msra.mxu1 %v1414_v47  ;;  %v454_v0 = vsel %vm419_vm3, %v451_v38, %v453_v58  ;;  %v436_v47 = vrot.slane %v1942_v13, 2 }
  0x58   : > { %1419 = vmatprep.subr.bf16.mxu0 %v1418_v55  ;;  %1423 = vmatprep.subr.bf16.mxu1 %v1418_v55  ;;  %v398_v42 = vsel %vm378_vm2, %v395_v18, %v397_v37 }
  0x59   : > { %598 = vrot.lane.b32.xlu1 %v1762_v59, %s1520_s8  ;;  %582 = vrot.lane.b32.xlu0 %v1765_v60, %s1520_s8 }
  0x5b   : > { %1421 = vmatpush3.bf16.msra.mxu0 %v1418_v55  ;;  %1426 = vmatpush3.bf16.msra.mxu1 %v1418_v55 }
  0x5c   : > { %1388 = vmatprep.subr.msk.mxu0 %vm1067_vm4, %v1010_v56  ;;  %1424 = vmatprep.subr.msk.mxu1 %vm1067_vm4, %v1010_v56 }
  0x5d   : > { %600 = vrot.lane.b32.xlu1 %v1768_v61, %s1520_s8  ;;  %584 = vrot.lane.b32.xlu0 %v1771_v62, %s1520_s8 }
  0x5f   : > { %1389 = vmatpush3.msk.msra.mxu0 %vm1067_vm4, %v1010_v56  ;;  %1427 = vmatpush3.msk.msra.mxu1 %vm1067_vm4, %v1010_v56 }
  0x61   : > { %646 = vrot.lane.b32.xlu1 %v1786_v3, %s1521_s9  ;;  %630 = vrot.lane.b32.xlu0 %v386_v4, %s1521_s9 }
  0x65   : > { %506 = vrot.lane.b32.xlu1 %v1786_v3, %s1518_s6  ;;  %490 = vrot.lane.b32.xlu0 %v386_v4, %s1518_s6  ;;  %v1918_v4 = vld [vmem:[%s1709_s5 + $0x48] sm:$0xff] }
  0x66   : > { %2405 = vst [vmem:[#allocation9_spill] sm:$0xff] %v1918_v4  ;;  %v394_v17 = vrot.slane %v1918_v4, 1  ;;  %v435_v46 = vrot.slane %v1918_v4, 2 }
  0x68   : > { %v396_v27 = vsel %vm378_vm2, %v394_v17, %v395_v18 }
  0x69   : > { %648 = vrot.lane.b32.xlu1 %v1800_v11, %s1521_s9  ;;  %632 = vrot.lane.b32.xlu0 %v388_v12, %s1521_s9 }
  0x6d   : > { %694 = vrot.lane.b32.xlu1 %v1809_v15, %s1522_s10  ;;  %678 = vrot.lane.b32.xlu0 %v427_v16, %s1522_s10 }
  0x71   : > { %508 = vrot.lane.b32.xlu1 %v1800_v11, %s1518_s6  ;;  %492 = vrot.lane.b32.xlu0 %v388_v12, %s1518_s6  ;;  %v1939_v12 = vld [vmem:[%s1709_s5 + $0xb0] sm:$0xff] }
  0x72   : > { %2406 = vst [vmem:[#allocation10_spill] sm:$0xff] %v1939_v12 }
  0x75   : > { %554 = vrot.lane.b32.xlu1 %v1809_v15, %s1519_s7  ;;  %538 = vrot.lane.b32.xlu0 %v427_v16, %s1519_s7  ;;  %v415_v16 = vrot.slane %v1939_v12, 1 }
  0x77   : > { %v416_v26 = vsel %vm378_vm2, %v414_v14, %v415_v16 }
  0x79   : > { %696 = vrot.lane.b32.xlu1 %v1822_v19, %s1522_s10  ;;  %680 = vrot.lane.b32.xlu0 %v429_v20, %s1522_s10 }
  0x7d   : > { %742 = vrot.lane.b32.xlu1 %v1829_v21, %s1523_s11  ;;  %726 = vrot.lane.b32.xlu0 %v1832_v22, %s1523_s11 }
  0x81   : > { %556 = vrot.lane.b32.xlu1 %v1822_v19, %s1519_s7  ;;  %540 = vrot.lane.b32.xlu0 %v429_v20, %s1519_s7 }
  0x85   : > { %602 = vrot.lane.b32.xlu1 %v1829_v21, %s1520_s8  ;;  %586 = vrot.lane.b32.xlu0 %v1832_v22, %s1520_s8 }
  0x89   : > { %744 = vrot.lane.b32.xlu1 %v1842_v23, %s1523_s11  ;;  %728 = vrot.lane.b32.xlu0 %v1845_v24, %s1523_s11 }
  0x8d   : > { %790 = vrot.lane.b32.xlu1 %v411_v29, %s1524_s12  ;;  %774 = vrot.lane.b32.xlu0 %v391_v30, %s1524_s12 }
  0x91   : > { %604 = vrot.lane.b32.xlu1 %v1842_v23, %s1520_s8  ;;  %588 = vrot.lane.b32.xlu0 %v1845_v24, %s1520_s8 }
  0x95   : > { %650 = vrot.lane.b32.xlu1 %v411_v29, %s1521_s9  ;;  %634 = vrot.lane.b32.xlu0 %v391_v30, %s1521_s9 }
  0x99   : > { %792 = vrot.lane.b32.xlu1 %v413_v44, %s1524_s12  ;;  %776 = vrot.lane.b32.xlu0 %v393_v45, %s1524_s12 }
  0x9d   : > { %838 = vrot.lane.b32.xlu1 %v452_v52, %s1525_s26  ;;  %822 = vrot.lane.b32.xlu0 %v432_v54, %s1525_s26 }
  0xa1   : > { %510 = vrot.lane.b32.xlu1 %v411_v29, %s1518_s6  ;;  %494 = vrot.lane.b32.xlu0 %v391_v30, %s1518_s6  ;;  %v347_v30 = vld [vmem:[%s1709_s5 + $0xb8] sm:$0x3] }
  0xa2   : > { %v417_v36 = vrot.slane %v347_v30, 1  ;;  %v458_v14 = vrot.slane %v347_v30, 2 }
  0xa4   : > { %v418_v41 = vsel %vm378_vm2, %v415_v16, %v417_v36  ;;  %v438_v16 = vrot.slane %v335_v31, 2 }
  0xa5   : > { %652 = vrot.lane.b32.xlu1 %v413_v44, %s1521_s9  ;;  %636 = vrot.lane.b32.xlu0 %v393_v45, %s1521_s9 }
  0xa9   : > { %698 = vrot.lane.b32.xlu1 %v452_v52, %s1522_s10  ;;  %682 = vrot.lane.b32.xlu0 %v432_v54, %s1522_s10 }
  0xad   : > { %840 = vrot.lane.b32.xlu1 %v454_v0, %s1525_s26  ;;  %824 = vrot.lane.b32.xlu0 %v434_v1, %s1525_s26 }
  0xb1   : > { %512 = vrot.lane.b32.xlu1 %v413_v44, %s1518_s6  ;;  %496 = vrot.lane.b32.xlu0 %v393_v45, %s1518_s6  ;;  %v455_v44 = vrot.slane %v1915_v2, 2  ;;  %v456_v45 = vrot.slane %v1939_v12, 2 }
  0xb5   : > { %558 = vrot.lane.b32.xlu1 %v452_v52, %s1519_s7  ;;  %542 = vrot.lane.b32.xlu0 %v432_v54, %s1519_s7  ;;  %v457_v52 = vsel %vm419_vm3, %v455_v44, %v456_v45  ;;  %v437_v54 = vsel %vm419_vm3, %v435_v46, %v436_v47 }
  0xb9   : > { %700 = vrot.lane.b32.xlu1 %v454_v0, %s1522_s10  ;;  %684 = vrot.lane.b32.xlu0 %v434_v1, %s1522_s10 }
  0xbb   : > { %v1920_v5 = vpop.permute.xlu1 %488  ;;  %v1922_v6 = vpop.permute.xlu0 %486 }
  0xbd   : > { %746 = vrot.lane.b32.xlu1 %v1915_v2, %s1523_s11  ;;  %730 = vrot.lane.b32.xlu0 %v1918_v4, %s1523_s11 }
  0xbf   : > { %v1928_v7 = vpop.permute.xlu1 %504  ;;  %v1930_v8 = vpop.permute.xlu0 %502 }
  0xc1   : > { %560 = vrot.lane.b32.xlu1 %v454_v0, %s1519_s7  ;;  %544 = vrot.lane.b32.xlu0 %v434_v1, %s1519_s7 }
  0xc3   : > { %v1934_v9 = vpop.permute.xlu1 %550  ;;  %v1936_v10 = vpop.permute.xlu0 %534 }
  0xc5   : > { %606 = vrot.lane.b32.xlu1 %v1915_v2, %s1520_s8  ;;  %590 = vrot.lane.b32.xlu0 %v1918_v4, %s1520_s8 }
  0xc7   : > { %v1952_v20 = vpop.permute.xlu1 %552  ;;  %v1954_v25 = vpop.permute.xlu0 %536 }
  0xc9   : > { %748 = vrot.lane.b32.xlu1 %v1939_v12, %s1523_s11  ;;  %732 = vrot.lane.b32.xlu0 %v1942_v13, %s1523_s11 }
  0xcb   : > { %v1962_v28 = vpop.permute.xlu1 %598  ;;  %v1964_v29 = vpop.permute.xlu0 %582 }
  0xcd   : > { %794 = vrot.lane.b32.xlu1 %v416_v26, %s1524_s12  ;;  %778 = vrot.lane.b32.xlu0 %v396_v27, %s1524_s12 }
  0xcf   : > { %v1970_v32 = vpop.permute.xlu1 %600  ;;  %v1972_v34 = vpop.permute.xlu0 %584 }
  0xd1   : > { %608 = vrot.lane.b32.xlu1 %v1939_v12, %s1520_s8  ;;  %592 = vrot.lane.b32.xlu0 %v1942_v13, %s1520_s8  ;;  %v2054_v12 = vld [vmem:[%s1709_s5 + $0xc8] sm:$0xff] }
  0xd2   : > { %v464_v15 = vrot.slane %v2054_v12, 1 }
  0xd3   : > { %v1978_v38 = vpop.permute.xlu1 %646  ;;  %v1980_v40 = vpop.permute.xlu0 %630 }
  0xd5   : > { %654 = vrot.lane.b32.xlu1 %v416_v26, %s1521_s9  ;;  %638 = vrot.lane.b32.xlu0 %v396_v27, %s1521_s9 }
  0xd7   : > { %v507_v48 = vpop.permute.xlu1 %506  ;;  %v491_v51 = vpop.permute.xlu0 %490 }
  0xd8   : > { %v881_v4 = vsel %vm870_vm5, %v1762_v59, %v507_v48  ;;  %v873_v2 = vsel %vm870_vm5, %v1765_v60, %v491_v51 }
  0xd9   : > { %796 = vrot.lane.b32.xlu1 %v418_v41, %s1524_s12  ;;  %780 = vrot.lane.b32.xlu0 %v398_v42, %s1524_s12 }
  0xdb   : > { %v1994_v55 = vpop.permute.xlu1 %648  ;;  %v1996_v56 = vpop.permute.xlu0 %632 }
  0xdd   : > { %842 = vrot.lane.b32.xlu1 %v457_v52, %s1525_s26  ;;  %826 = vrot.lane.b32.xlu0 %v437_v54, %s1525_s26 }
  0xdf   : > { %v2000_v58 = vpop.permute.xlu1 %694  ;;  %v2002_v63 = vpop.permute.xlu0 %678 }
  0xe1   : > { %514 = vrot.lane.b32.xlu1 %v416_v26, %s1518_s6  ;;  %498 = vrot.lane.b32.xlu0 %v396_v27, %s1518_s6  ;;  %v459_v26 = vsel %vm419_vm3, %v456_v45, %v458_v14  ;;  %v439_v27 = vsel %vm419_vm3, %v436_v47, %v438_v16  ;;  %v2037_v14 = vld [vmem:[%s1709_s5 + $0xc0] sm:$0xff] }
  0xe2   : > { %v463_v19 = vrot.slane %v2037_v14, 1 }
  0xe3   : > { %v2006_v0 = vpop.permute.xlu1 %508  ;;  %v2008_v1 = vpop.permute.xlu0 %492 }
  0xe5   : > { %656 = vrot.lane.b32.xlu1 %v418_v41, %s1521_s9  ;;  %640 = vrot.lane.b32.xlu0 %v398_v42, %s1521_s9 }
  0xe7   : > { %v555_v17 = vpop.permute.xlu1 %554  ;;  %v539_v18 = vpop.permute.xlu0 %538 }
  0xe9   : > { %702 = vrot.lane.b32.xlu1 %v457_v52, %s1522_s10  ;;  %686 = vrot.lane.b32.xlu0 %v437_v54, %s1522_s10 }
  0xeb   : > { %v2016_v36 = vpop.permute.xlu1 %696  ;;  %v2018_v37 = vpop.permute.xlu0 %680 }
  0xed   : > { %844 = vrot.lane.b32.xlu1 %v459_v26, %s1525_s26  ;;  %828 = vrot.lane.b32.xlu0 %v439_v27, %s1525_s26 }
  0xef   : > { %v2022_v30 = vpop.permute.xlu1 %742  ;;  %v2024_v31 = vpop.permute.xlu0 %726 }
  0xf1   : > { %516 = vrot.lane.b32.xlu1 %v418_v41, %s1518_s6  ;;  %500 = vrot.lane.b32.xlu0 %v398_v42, %s1518_s6 }
  0xf3   : > { %v2028_v44 = vpop.permute.xlu1 %556  ;;  %v2030_v45 = vpop.permute.xlu0 %540 }
  0xf5   : > { %562 = vrot.lane.b32.xlu1 %v457_v52, %s1519_s7  ;;  %546 = vrot.lane.b32.xlu0 %v437_v54, %s1519_s7 }
  0xf7   : > { %v603_v46 = vpop.permute.xlu1 %602  ;;  %v587_v47 = vpop.permute.xlu0 %586 }
  0xf9   : > { %704 = vrot.lane.b32.xlu1 %v459_v26, %s1522_s10  ;;  %688 = vrot.lane.b32.xlu0 %v439_v27, %s1522_s10 }
  0xfb   : > { %v2039_v41 = vpop.permute.xlu1 %744  ;;  %v2041_v42 = vpop.permute.xlu0 %728 }
  0xfd   : > { %750 = vrot.lane.b32.xlu1 %v2037_v14, %s1523_s11  ;;  %734 = vrot.lane.b32.xlu0 %v1726_v43, %s1523_s11 }
  0xff   : > { %v791_v52 = vpop.permute.xlu1 %790  ;;  %v775_v54 = vpop.permute.xlu0 %774 }
 0x101   : > { %564 = vrot.lane.b32.xlu1 %v459_v26, %s1519_s7  ;;  %548 = vrot.lane.b32.xlu0 %v439_v27, %s1519_s7  ;;  %v898_v26 = vsel %vm887_vm6, %v881_v4, %v555_v17  ;;  %v890_v27 = vsel %vm887_vm6, %v873_v2, %v539_v18  ;;  %v871_v2 = vsel %vm870_vm5, %v1716_v35, %v1922_v6 }
 0x102   : > { %v915_v48 = vsel %vm904_vm7, %v898_v26, %v603_v46  ;;  %v907_v11 = vsel %vm904_vm7, %v890_v27, %v587_v47  ;;  %v879_v4 = vsel %vm870_vm5, %v1726_v43, %v1930_v8  ;;  %v465_v18 = vsel %vm378_vm2, %v463_v19, %v464_v15 }
 0x103   : > { %v2049_v16 = vpop.permute.xlu1 %604  ;;  %v2051_v13 = vpop.permute.xlu0 %588  ;;  %v896_v17 = vsel %vm887_vm6, %v879_v4, %v1934_v9  ;;  %v469_v4 = vrot.slane %v2054_v12, 2 }
 0x104   : > { %v913_v35 = vsel %vm904_vm7, %v896_v17, %v1962_v28 }
 0x105   : > { %610 = vrot.lane.b32.xlu1 %v2037_v14, %s1520_s8  ;;  %594 = vrot.lane.b32.xlu0 %v1726_v43, %s1520_s8  ;;  %v930_v46 = vsel %vm921_vm8, %v913_v35, %v1978_v38 }
 0x106   : > { %v947_v19 = vsel %vm938_vm9, %v930_v46, %v2000_v58 }
 0x107   : > { %v651_v60 = vpop.permute.xlu1 %650  ;;  %v635_v51 = vpop.permute.xlu0 %634  ;;  %v964_v28 = vsel %vm955_vm10, %v947_v19, %v2022_v30 }
 0x108   : > { %v2071_v3 = vsel %vm921_vm8, %v915_v48, %v651_v60  ;;  %v2074_v24 = vsel %vm921_vm8, %v907_v11, %v635_v51  ;;  %v888_v11 = vsel %vm887_vm6, %v871_v2, %v1936_v10  ;;  %v981_v38 = vsel %vm972_vm11, %v964_v28, %v791_v52 }
 0x109   : > { %752 = vrot.lane.b32.xlu1 %v2054_v12, %s1523_s11  ;;  %736 = vrot.lane.b32.xlu0 %v1721_v39, %s1523_s11  ;;  %v905_v43 = vsel %vm904_vm7, %v888_v11, %v1964_v29  ;;  %v874_v48 = vsel %vm870_vm5, %v1771_v62, %v2008_v1  ;;  %v468_v60 = vrot.slane %v2037_v14, 2 }
 0x10a   : > { %v922_v9 = vsel %vm921_vm8, %v905_v43, %v1980_v40  ;;  %v891_v2 = vsel %vm887_vm6, %v874_v48, %v2030_v45 }
 0x10b   : > { %v793_v6 = vpop.permute.xlu1 %792  ;;  %v777_v8 = vpop.permute.xlu0 %776  ;;  %v939_v10 = vsel %vm938_vm9, %v922_v9, %v2002_v63  ;;  %v350_v63 = vld [vmem:[%s1709_s5 + $0xd0] sm:$0x3]  ;;  %v908_v1 = vsel %vm904_vm7, %v891_v2, %v2051_v13 }
 0x10c   : > { %v956_v29 = vsel %vm955_vm10, %v939_v10, %v2024_v31  ;;  %v466_v30 = vrot.slane %v350_v63, 1 }
 0x10d   : > { %798 = vrot.lane.b32.xlu1 %v465_v18, %s1524_s12  ;;  %782 = vrot.lane.b32.xlu0 %v1739_v50, %s1524_s12  ;;  %v973_v40 = vsel %vm972_vm11, %v956_v29, %v775_v54  ;;  %v882_v54 = vsel %vm870_vm5, %v1768_v61, %v2006_v0 }
 0x10e   : > { %v899_v51 = vsel %vm887_vm6, %v882_v54, %v2028_v44  ;;  %v467_v0 = vsel %vm378_vm2, %v464_v15, %v466_v30  ;;  %v880_v15 = vsel %vm870_vm5, %v1721_v39, %v1928_v7 }
 0x10f   : > { %v839_v58 = vpop.permute.xlu1 %838  ;;  %v823_v47 = vpop.permute.xlu0 %822  ;;  %v916_v62 = vsel %vm904_vm7, %v899_v51, %v2049_v16  ;;  %v470_v16 = vsel %vm419_vm3, %v468_v60, %v469_v4 }
 0x110   : > { %v998_v26 = vsel %vm989_vm12, %v981_v38, %v839_v58  ;;  %v990_v27 = vsel %vm989_vm12, %v973_v40, %v823_v47  ;;  %v352_v40 = vld [vmem:[%s1709_s5 + $0xe0] sm:$0xff] }
 0x111   : > { %612 = vrot.lane.b32.xlu1 %v2054_v12, %s1520_s8  ;;  %1402 = vmatprep.mubr.msk.f32.mxu1 %vm1018_vm13, %v998_v26  ;;  %v897_v12 = vsel %vm887_vm6, %v880_v15, %v1952_v20  ;;  %v477_v47 = vrot.slane %v352_v40, 1  ;;  %v2408_v26 = vld [vmem:[#allocation7_spill] sm:$0xff] }
 0x112   : > { %596 = vrot.lane.b32.xlu0 %v1721_v39, %s1520_s8  ;;  %1390 = vmatprep.mubr.msk.f32.mxu0 %vm1018_vm13, %v990_v27 }
 0x113   : > { %v511_v31 = vpop.permute.xlu1 %510  ;;  %v495_v52 = vpop.permute.xlu0 %494 }
 0x114   : > { %v883_v46 = vsel %vm870_vm5, %v1829_v21, %v511_v31  ;;  %v351_v21 = vld [vmem:[%s1709_s5 + $0xd8] sm:$0xff] }
 0x115   : > { %658 = vrot.lane.b32.xlu1 %v465_v18, %s1521_s9  ;;  %v476_v58 = vrot.slane %v351_v21, 1 }
 0x116   : > { %642 = vrot.lane.b32.xlu0 %v1739_v50, %s1521_s9  ;;  %v872_v50 = vsel %vm870_vm5, %v1712_v33, %v1920_v5  ;;  %v914_v33 = vsel %vm904_vm7, %v897_v12, %v1970_v32 }
 0x117   : > { %v653_v14 = vpop.permute.xlu1 %652  ;;  %v637_v17 = vpop.permute.xlu0 %636  ;;  %v889_v13 = vsel %vm887_vm6, %v872_v50, %v1954_v25  ;;  %v931_v20 = vsel %vm921_vm8, %v914_v33, %v1994_v55 }
 0x118   : > { %v2142_v44 = vsel %vm921_vm8, %v916_v62, %v653_v14  ;;  %v2145_v45 = vsel %vm921_vm8, %v908_v1, %v637_v17  ;;  %v906_v5 = vsel %vm904_vm7, %v889_v13, %v1972_v34  ;;  %v948_v11 = vsel %vm938_vm9, %v931_v20, %v2016_v36  ;;  %v2409_v62 = vld [vmem:[#allocation3_spill] sm:$0xff]  ;;  %v2410_v17 = vld [vmem:[#allocation4_spill] sm:$0xff] }
 0x119   : > { %800 = vrot.lane.b32.xlu1 %v467_v0, %s1524_s12  ;;  %v923_v25 = vsel %vm921_vm8, %v906_v5, %v1996_v56  ;;  %v965_v32 = vsel %vm955_vm10, %v948_v11, %v2039_v41  ;;  %v471_v41 = vrot.slane %v350_v63, 2 }
 0x11a   : > { %784 = vrot.lane.b32.xlu0 %v1736_v49, %s1524_s12  ;;  %v940_v18 = vsel %vm938_vm9, %v923_v25, %v2018_v37  ;;  %v982_v55 = vsel %vm972_vm11, %v965_v32, %v793_v6 }
 0x11b   : > { %v2165_v39 = vpop.permute.xlu1 %698  ;;  %v2167_v7 = vpop.permute.xlu0 %682  ;;  %v957_v34 = vsel %vm955_vm10, %v940_v18, %v2041_v42  ;;  %v2412_v18 = vld [vmem:[#allocation6_spill] sm:$0xff] }
 0x11c   : > { %v974_v56 = vsel %vm972_vm11, %v957_v34, %v777_v8  ;;  %v472_v8 = vsel %vm419_vm3, %v469_v4, %v471_v41  ;;  %v481_v4 = vrot.slane %v351_v21, 2 }
 0x11d   : > { %846 = vrot.lane.b32.xlu1 %v470_v16, %s1525_s26 }
 0x11e   : > { %830 = vrot.lane.b32.xlu0 %v1748_v53, %s1525_s26 }
 0x11f   : > { %v841_v35 = vpop.permute.xlu1 %840  ;;  %v825_v36 = vpop.permute.xlu0 %824 }
 0x120   : > { %v999_v43 = vsel %vm989_vm12, %v982_v55, %v841_v35  ;;  %v991_v37 = vsel %vm989_vm12, %v974_v56, %v825_v36 }
 0x121   : > { %660 = vrot.lane.b32.xlu1 %v467_v0, %s1521_s9  ;;  %1403 = vmatmul.mubr.msk.f32.vlgmr.msra.gmra.mrb[0].mxu1 %vm1018_vm13, %v999_v43  ;;  %v482_v0 = vrot.slane %v352_v40, 2  ;;  %v949_v43 = vsel %vm938_vm9, %v2071_v3, %v2165_v39 }
 0x122   : > { %644 = vrot.lane.b32.xlu0 %v1736_v49, %s1521_s9  ;;  %1391 = vmatmul.mubr.msk.f32.vlgmr.msra.gmra.mrb[0].mxu0 %vm1018_vm13, %v991_v37  ;;  %v875_v49 = vsel %vm870_vm5, %v1832_v22, %v495_v52  ;;  %v941_v37 = vsel %vm938_vm9, %v2074_v24, %v2167_v7 }
 0x123   : > { %v513_v42 = vpop.permute.xlu1 %512  ;;  %v497_v6 = vpop.permute.xlu0 %496  ;;  %v483_v50 = vsel %vm419_vm3, %v481_v4, %v482_v0 }
 0x124   : > { %v884_v63 = vsel %vm870_vm5, %v1842_v23, %v513_v42  ;;  %v876_v27 = vsel %vm870_vm5, %v2408_v26, %v497_v6 }
 0x125   : > { %706 = vrot.lane.b32.xlu1 %v470_v16, %s1522_s10  ;;  %v2411_v16 = vld [vmem:[#allocation5_spill] sm:$0xff] }
 0x126   : > { %690 = vrot.lane.b32.xlu0 %v1748_v53, %s1522_s10 }
 0x127   : > { %v559_v9 = vpop.permute.xlu1 %558  ;;  %v543_v19 = vpop.permute.xlu0 %542 }
 0x128   : > { %v900_v10 = vsel %vm887_vm6, %v883_v46, %v559_v9  ;;  %v892_v28 = vsel %vm887_vm6, %v875_v49, %v543_v19 }
 0x129   : > { %848 = vrot.lane.b32.xlu1 %v472_v8, %s1525_s26 }
 0x12a   : > { %832 = vrot.lane.b32.xlu0 %v1755_v57, %s1525_s26 }
 0x12b   : > { %v2206_v53 = vpop.permute.xlu1 %700  ;;  %v2208_v29 = vpop.permute.xlu0 %684 }
 0x12d   : > { %708 = vrot.lane.b32.xlu1 %v472_v8, %s1522_s10 }
 0x12e   : > { %692 = vrot.lane.b32.xlu0 %v1755_v57, %s1522_s10  ;;  %v353_v57 = vld [vmem:[%s1709_s5 + $0xe8] sm:$0x3] }
 0x12f   : > { %v747_v22 = vpop.permute.xlu1 %746  ;;  %v731_v38 = vpop.permute.xlu0 %730  ;;  %v479_v48 = vrot.slane %v353_v57, 1  ;;  %v484_v15 = vrot.slane %v353_v57, 2 }
 0x130   : > { %v966_v41 = vsel %vm955_vm10, %v949_v43, %v747_v22  ;;  %v958_v42 = vsel %vm955_vm10, %v941_v37, %v731_v38  ;;  %v950_v38 = vsel %vm938_vm9, %v2142_v44, %v2206_v53  ;;  %v2413_v53 = vld [vmem:[#allocation8_spill] sm:$0xff] }
 0x131   : > { %754 = vrot.lane.b32.xlu1 %v351_v21, %s1523_s11  ;;  %v480_v1 = vsel %vm378_vm2, %v477_v47, %v479_v48  ;;  %v485_v33 = vsel %vm419_vm3, %v482_v0, %v484_v15 }
 0x132   : > { %738 = vrot.lane.b32.xlu0 %v1762_v59, %s1523_s11  ;;  %v478_v59 = vsel %vm378_vm2, %v476_v58, %v477_v47 }
 0x133   : > { %v561_v30 = vpop.permute.xlu1 %560  ;;  %v545_v31 = vpop.permute.xlu0 %544 }
 0x134   : > { %v901_v52 = vsel %vm887_vm6, %v884_v63, %v561_v30  ;;  %v893_v54 = vsel %vm887_vm6, %v876_v27, %v545_v31 }
 0x135   : > { %756 = vrot.lane.b32.xlu1 %v352_v40, %s1523_s11  ;;  %v942_v40 = vsel %vm938_vm9, %v2145_v45, %v2208_v29 }
 0x136   : > { %740 = vrot.lane.b32.xlu0 %v1768_v61, %s1523_s11 }
 0x137   : > { %v607_v60 = vpop.permute.xlu1 %606  ;;  %v591_v23 = vpop.permute.xlu0 %590 }
 0x138   : > { %v917_v51 = vsel %vm904_vm7, %v900_v10, %v607_v60  ;;  %v909_v2 = vsel %vm904_vm7, %v892_v28, %v591_v23 }
 0x139   : > { %802 = vrot.lane.b32.xlu1 %v478_v59, %s1524_s12 }
 0x13a   : > { %786 = vrot.lane.b32.xlu0 %v2409_v62, %s1524_s12 }
 0x13b   : > { %v749_v14 = vpop.permute.xlu1 %748  ;;  %v733_v61 = vpop.permute.xlu0 %732 }
 0x13c   : > { %v967_v58 = vsel %vm955_vm10, %v950_v38, %v749_v14  ;;  %v959_v47 = vsel %vm955_vm10, %v942_v40, %v733_v61 }
 0x13d   : > { %804 = vrot.lane.b32.xlu1 %v480_v1, %s1524_s12 }
 0x13e   : > { %788 = vrot.lane.b32.xlu0 %v2410_v17, %s1524_s12 }
 0x13f   : > { %v795_v12 = vpop.permute.xlu1 %794  ;;  %v779_v13 = vpop.permute.xlu0 %778 }
 0x140   : > { %v983_v6 = vsel %vm972_vm11, %v966_v41, %v795_v12  ;;  %v975_v8 = vsel %vm972_vm11, %v958_v42, %v779_v13 }
 0x141   : > { %850 = vrot.lane.b32.xlu1 %v483_v50, %s1525_s26 }
 0x142   : > { %834 = vrot.lane.b32.xlu0 %v2411_v16, %s1525_s26 }
 0x143   : > { %v609_v5 = vpop.permute.xlu1 %608  ;;  %v593_v20 = vpop.permute.xlu0 %592 }
 0x144   : > { %v918_v25 = vsel %vm904_vm7, %v901_v52, %v609_v5  ;;  %v910_v11 = vsel %vm904_vm7, %v893_v54, %v593_v20  ;;  %v2414_v52 = vld [vmem:[#allocation9_spill] sm:$0xff] }
 0x145   : > { %852 = vrot.lane.b32.xlu1 %v485_v33, %s1525_s26 }
 0x146   : > { %836 = vrot.lane.b32.xlu0 %v2412_v18, %s1525_s26 }
 0x147   : > { %v655_v32 = vpop.permute.xlu1 %654  ;;  %v639_v34 = vpop.permute.xlu0 %638 }
 0x148   : > { %v2249_v55 = vsel %vm921_vm8, %v917_v51, %v655_v32  ;;  %v2252_v56 = vsel %vm921_vm8, %v909_v2, %v639_v34 }
 0x14b   : > { %v797_v35 = vpop.permute.xlu1 %796  ;;  %v781_v36 = vpop.permute.xlu0 %780 }
 0x14c   : > { %v984_v63 = vsel %vm972_vm11, %v967_v58, %v797_v35  ;;  %v976_v26 = vsel %vm972_vm11, %v959_v47, %v781_v36 }
 0x14f   : > { %v843_v46 = vpop.permute.xlu1 %842  ;;  %v827_v49 = vpop.permute.xlu0 %826 }
 0x150   : > { %v1000_v9 = vsel %vm989_vm12, %v983_v6, %v843_v46  ;;  %v992_v19 = vsel %vm989_vm12, %v975_v8, %v827_v49 }
 0x151   : > { %1393 = vmatprep.mubr.msk.f32.mxu0 %vm1018_vm13, %v992_v19  ;;  %1405 = vmatprep.mubr.msk.f32.mxu1 %vm1018_vm13, %v1000_v9 }
 0x153   : > { %v515_v3 = vpop.permute.xlu1 %514  ;;  %v499_v24 = vpop.permute.xlu0 %498 }
 0x154   : > { %v885_v29 = vsel %vm870_vm5, %v2413_v53, %v515_v3  ;;  %v877_v54 = vsel %vm870_vm5, %v2414_v52, %v499_v24 }
 0x157   : > { %v657_v39 = vpop.permute.xlu1 %656  ;;  %v641_v7 = vpop.permute.xlu0 %640 }
 0x158   : > { %v935_v10 = vsel %vm921_vm8, %v918_v25, %v657_v39  ;;  %v927_v28 = vsel %vm921_vm8, %v910_v11, %v641_v7 }
 0x15b   : > { %v703_v21 = vpop.permute.xlu1 %702  ;;  %v687_v22 = vpop.permute.xlu0 %686 }
 0x15c   : > { %v951_v11 = vsel %vm938_vm9, %v2249_v55, %v703_v21  ;;  %v943_v18 = vsel %vm938_vm9, %v2252_v56, %v687_v22 }
 0x15f   : > { %v845_v27 = vpop.permute.xlu1 %844  ;;  %v829_v30 = vpop.permute.xlu0 %828 }
 0x160   : > { %v1001_v31 = vsel %vm989_vm12, %v984_v63, %v845_v27  ;;  %v993_v57 = vsel %vm989_vm12, %v976_v26, %v829_v30 }
 0x161   : > { %1394 = vmatmul.mubr.msk.f32.gmra.mrb[2].mxu0 %vm1018_vm13, %v993_v57  ;;  %1406 = vmatmul.mubr.msk.f32.gmra.mrb[2].mxu1 %vm1018_vm13, %v1001_v31 }
 0x163   : > { %v2284_v44 = vpop.permute.xlu1 %516  ;;  %v2286_v45 = vpop.permute.xlu0 %500 }
 0x167   : > { %v563_v59 = vpop.permute.xlu1 %562  ;;  %v547_v48 = vpop.permute.xlu0 %546 }
 0x168   : > { %v902_v60 = vsel %vm887_vm6, %v885_v29, %v563_v59  ;;  %v894_v23 = vsel %vm887_vm6, %v877_v54, %v547_v48  ;;  %v2415_v29 = vld [vmem:[#allocation10_spill] sm:$0xff]  ;;  %v2416_v48 = vld [vmem:[#allocation11_spill] sm:$0xff] }
 0x169   : > { %v886_v52 = vsel %vm870_vm5, %v2415_v29, %v2284_v44 }
 0x16b   : > { %v705_v51 = vpop.permute.xlu1 %704  ;;  %v689_v2 = vpop.permute.xlu0 %688 }
 0x16c   : > { %v952_v46 = vsel %vm938_vm9, %v935_v10, %v705_v51  ;;  %v944_v49 = vsel %vm938_vm9, %v927_v28, %v689_v2  ;;  %v878_v51 = vsel %vm870_vm5, %v2416_v48, %v2286_v45 }
 0x16f   : > { %v751_v4 = vpop.permute.xlu1 %750  ;;  %v735_v0 = vpop.permute.xlu0 %734 }
 0x170   : > { %v968_v32 = vsel %vm955_vm10, %v951_v11, %v751_v4  ;;  %v960_v34 = vsel %vm955_vm10, %v943_v18, %v735_v0 }
 0x173   : > { %v565_v62 = vpop.permute.xlu1 %564  ;;  %v549_v1 = vpop.permute.xlu0 %548 }
 0x174   : > { %v895_v4 = vsel %vm887_vm6, %v878_v51, %v549_v1 }
 0x177   : > { %v611_v14 = vpop.permute.xlu1 %610  ;;  %v595_v61 = vpop.permute.xlu0 %594 }
 0x178   : > { %v919_v27 = vsel %vm904_vm7, %v902_v60, %v611_v14  ;;  %v911_v31 = vsel %vm904_vm7, %v894_v23, %v595_v61  ;;  %v903_v60 = vsel %vm887_vm6, %v886_v52, %v565_v62 }
 0x17b   : > { %v753_v17 = vpop.permute.xlu1 %752  ;;  %v737_v50 = vpop.permute.xlu0 %736 }
 0x17c   : > { %v969_v9 = vsel %vm955_vm10, %v952_v46, %v753_v17  ;;  %v961_v19 = vsel %vm955_vm10, %v944_v49, %v737_v50 }
 0x17f   : > { %v799_v15 = vpop.permute.xlu1 %798  ;;  %v783_v12 = vpop.permute.xlu0 %782 }
 0x180   : > { %v985_v35 = vsel %vm972_vm11, %v968_v32, %v799_v15  ;;  %v977_v43 = vsel %vm972_vm11, %v960_v34, %v783_v12 }
 0x183   : > { %v613_v13 = vpop.permute.xlu1 %612 }
 0x184   : > { %v597_v16 = vpop.permute.xlu0 %596  ;;  %v920_v0 = vsel %vm904_vm7, %v903_v60, %v613_v13 }
 0x185   : > { %v912_v17 = vsel %vm904_vm7, %v895_v4, %v597_v16 }
 0x187   : > { %v659_v33 = vpop.permute.xlu1 %658 }
 0x188   : > { %v643_v5 = vpop.permute.xlu0 %642  ;;  %v936_v57 = vsel %vm921_vm8, %v919_v27, %v659_v33 }
 0x189   : > { %v928_v54 = vsel %vm921_vm8, %v911_v31, %v643_v5 }
 0x18b   : > { %v801_v20 = vpop.permute.xlu1 %800 }
 0x18c   : > { %v785_v25 = vpop.permute.xlu0 %784  ;;  %v986_v3 = vsel %vm972_vm11, %v969_v9, %v801_v20 }
 0x18d   : > { %v978_v39 = vsel %vm972_vm11, %v961_v19, %v785_v25 }
 0x18f   : > { %v847_v36 = vpop.permute.xlu1 %846 }
 0x190   : > { %v1002_v37 = vsel %vm989_vm12, %v985_v35, %v847_v36  ;;  %v831_v41 = vpop.permute.xlu0 %830  ;;  %v1338_v35 = vld [vmem:[%s2388_s2] ss:$0 sm:$0xff] }
 0x191   : > { %v994_v42 = vsel %vm989_vm12, %v977_v43, %v831_v41  ;;  %1408 = vmatprep.mubr.msk.f32.mxu1 %vm1018_vm13, %v1002_v37 }
 0x192   : > { %1396 = vmatprep.mubr.msk.f32.mxu0 %vm1018_vm13, %v994_v42 }
 0x193   : > { %v661_v55 = vpop.permute.xlu1 %660 }
 0x194   : > { %v645_v56 = vpop.permute.xlu0 %644  ;;  %v937_v50 = vsel %vm921_vm8, %v920_v0, %v661_v55 }
 0x195   : > { %v929_v12 = vsel %vm921_vm8, %v912_v17, %v645_v56 }
 0x197   : > { %v707_v6 = vpop.permute.xlu1 %706 }
 0x198   : > { %v691_v8 = vpop.permute.xlu0 %690  ;;  %v953_v59 = vsel %vm938_vm9, %v936_v57, %v707_v6 }
 0x199   : > { %v945_v2 = vsel %vm938_vm9, %v928_v54, %v691_v8 }
 0x19b   : > { %v849_v24 = vpop.permute.xlu1 %848 }
 0x19c   : > { %v1003_v7 = vsel %vm989_vm12, %v986_v3, %v849_v24  ;;  %v833_v21 = vpop.permute.xlu0 %832 }
 0x19d   : > { %v995_v22 = vsel %vm989_vm12, %v978_v39, %v833_v21  ;;  %1409 = vmatmul.mubr.msk.f32.gmra.mrb[4].mxu1 %vm1018_vm13, %v1003_v7 }
 0x19e   : > { %1397 = vmatmul.mubr.msk.f32.gmra.mrb[4].mxu0 %vm1018_vm13, %v995_v22 }
 0x19f   : > { %v709_v10 = vpop.permute.xlu1 %708 }
 0x1a0   : > { %v693_v28 = vpop.permute.xlu0 %692  ;;  %v954_v1 = vsel %vm938_vm9, %v937_v50, %v709_v10 }
 0x1a1   : > { %v946_v33 = vsel %vm938_vm9, %v929_v12, %v693_v28 }
 0x1a3   : > { %v755_v38 = vpop.permute.xlu1 %754 }
 0x1a4   : > { %v739_v40 = vpop.permute.xlu0 %738  ;;  %v970_v23 = vsel %vm955_vm10, %v953_v59, %v755_v38 }
 0x1a5   : > { %v962_v44 = vsel %vm955_vm10, %v945_v2, %v739_v40 }
 0x1a7   : > { %v757_v58 = vpop.permute.xlu1 %756 }
 0x1a8   : > { %v741_v47 = vpop.permute.xlu0 %740  ;;  %v971_v5 = vsel %vm955_vm10, %v954_v1, %v757_v58 }
 0x1a9   : > { %v963_v16 = vsel %vm955_vm10, %v946_v33, %v741_v47 }
 0x1ab   : > { %v803_v63 = vpop.permute.xlu1 %802 }
 0x1ac   : > { %v787_v26 = vpop.permute.xlu0 %786  ;;  %v987_v14 = vsel %vm972_vm11, %v970_v23, %v803_v63 }
 0x1ad   : > { %v979_v45 = vsel %vm972_vm11, %v962_v44, %v787_v26 }
 0x1af   : > { %v805_v30 = vpop.permute.xlu1 %804 }
 0x1b0   : > { %v789_v53 = vpop.permute.xlu0 %788  ;;  %v988_v20 = vsel %vm972_vm11, %v971_v5, %v805_v30 }
 0x1b1   : > { %v980_v11 = vsel %vm972_vm11, %v963_v16, %v789_v53 }
 0x1b3   : > { %v851_v61 = vpop.permute.xlu1 %850 }
 0x1b4   : > { %v1004_v62 = vsel %vm989_vm12, %v987_v14, %v851_v61  ;;  %v835_v15 = vpop.permute.xlu0 %834 }
 0x1b5   : > { %v996_v13 = vsel %vm989_vm12, %v979_v45, %v835_v15  ;;  %1411 = vmatprep.mubr.msk.f32.mxu1 %vm1018_vm13, %v1004_v62 }
 0x1b6   : > { %1399 = vmatprep.mubr.msk.f32.mxu0 %vm1018_vm13, %v996_v13 }
 0x1b7   : > { %v853_v25 = vpop.permute.xlu1 %852 }
 0x1b8   : > { %v1005_v18 = vsel %vm989_vm12, %v988_v20, %v853_v25  ;;  %v837_v32 = vpop.permute.xlu0 %836 }
 0x1b9   : > { %v997_v34 = vsel %vm989_vm12, %v980_v11, %v837_v32  ;;  %1412 = vmatmul.mubr.msk.f32.gmra.mrb[6].mxu1 %vm1018_vm13, %v1005_v18 }
 0x1ba   : > { %1400 = vmatmul.mubr.msk.f32.gmra.mrb[6].mxu0 %vm1018_vm13, %v997_v34 }
 0x1f4   : > { %v1404_v36 = vpop.f32.mrb[0].mxu1 }
 0x1f5   : > { %v1392_v43 = vpop.f32.mrb[0].mxu0  ;;  %v1183_v37 = vadd.f32 %v1404_v36, %v1338_v35  ;;  %v1177_v41 = vpop.f32.mrb[1].mxu1 }
 0x1f6   : > { %v1143_v42 = vadd.f32 %v1392_v43, %v1338_v35  ;;  %v1137_v55 = vpop.f32.mrb[1].mxu0  ;;  %v1178_v56 = vadd.f32 %v1338_v35, %v1177_v41 }
 0x1f7   : > { %1225 = vst [vmem:[%s1587_s30 + $0x48] sm:$0xff] %v1183_v37  ;;  %v1138_v6 = vadd.f32 %v1338_v35, %v1137_v55 }
 0x1f8   : > { %1217 = vst [vmem:[%s1587_s30 + $0x8] sm:$0xff] %v1143_v42  ;;  %1224 = vst [vmem:[%s1587_s30 + $0x40] sm:$0xff] %v1178_v56 }
 0x1f9   : > { %1216 = vst [vmem:[%s1587_s30] sm:$0xff] %v1138_v6 }
 0x234   : > { %v1395_v8 = vpop.f32.mrb[2].mxu0  ;;  %v1407_v46 = vpop.f32.mrb[2].mxu1 }
 0x235   : > { %v1153_v49 = vadd.f32 %v1395_v8, %v1338_v35  ;;  %v1193_v9 = vadd.f32 %v1407_v46, %v1338_v35  ;;  %v1147_v19 = vpop.f32.mrb[3].mxu0  ;;  %v1187_v3 = vpop.f32.mrb[3].mxu1 }
 0x236   : > { %v1148_v24 = vadd.f32 %v1338_v35, %v1147_v19  ;;  %v1188_v39 = vadd.f32 %v1338_v35, %v1187_v3 }
 0x237   : > { %1219 = vst [vmem:[%s1587_s30 + $0x18] sm:$0xff] %v1153_v49  ;;  %1227 = vst [vmem:[%s1587_s30 + $0x58] sm:$0xff] %v1193_v9 }
 0x238   : > { %1218 = vst [vmem:[%s1587_s30 + $0x10] sm:$0xff] %v1148_v24  ;;  %1226 = vst [vmem:[%s1587_s30 + $0x50] sm:$0xff] %v1188_v39 }
 0x270   : > { %v1410_v7 = vpop.f32.mrb[4].mxu1 }
 0x271   : > { %v1398_v21 = vpop.f32.mrb[4].mxu0  ;;  %v1203_v22 = vadd.f32 %v1410_v7, %v1338_v35  ;;  %v1197_v10 = vpop.f32.mrb[5].mxu1 }
 0x272   : > { %v1163_v28 = vadd.f32 %v1398_v21, %v1338_v35  ;;  %v1157_v38 = vpop.f32.mrb[5].mxu0  ;;  %v1198_v40 = vadd.f32 %v1338_v35, %v1197_v10 }
 0x273   : > { %1229 = vst [vmem:[%s1587_s30 + $0x68] sm:$0xff] %v1203_v22  ;;  %v1158_v58 = vadd.f32 %v1338_v35, %v1157_v38 }
 0x274   : > { %1221 = vst [vmem:[%s1587_s30 + $0x28] sm:$0xff] %v1163_v28  ;;  %1228 = vst [vmem:[%s1587_s30 + $0x60] sm:$0xff] %v1198_v40 }
 0x275   : > { %1220 = vst [vmem:[%s1587_s30 + $0x20] sm:$0xff] %v1158_v58 }
 0x28c   : > { %v1413_v47 = vpop.f32.mrb[6].mxu1 }
 0x28d   : > { %v1401_v63 = vpop.f32.mrb[6].mxu0  ;;  %v1213_v26 = vadd.f32 %v1413_v47, %v1338_v35  ;;  %v1207_v27 = vpop.f32.mrb[7].mxu1 }
 0x28e   : > { %v1173_v30 = vadd.f32 %v1401_v63, %v1338_v35  ;;  %v1167_v31 = vpop.f32.mrb[7].mxu0  ;;  %v1208_v57 = vadd.f32 %v1338_v35, %v1207_v27 }
 0x28f   : > { %1231 = vst [vmem:[%s1587_s30 + $0x78] sm:$0xff] %v1213_v26  ;;  %v1168_v53 = vadd.f32 %v1338_v35, %v1167_v31 }
 0x290   : > { %1223 = vst [vmem:[%s1587_s30 + $0x38] sm:$0xff] %v1173_v30  ;;  %1230 = vst [vmem:[%s1587_s30 + $0x70] sm:$0xff] %v1208_v57 }
 0x291   : > { %1222 = vst [vmem:[%s1587_s30 + $0x30] sm:$0xff] %v1168_v53 }
 0x292 PF: > { %s13_s16 = sadd.s32 1, %s1515_s16   ;;  %s2417_s12 = smov %s1507_s14 }
 0x293   : > { %p10_p8 = scmp.ge.s32.totalorder %s13_s16, 6   ;;  %s2418_s13 = smov %s1511_s15 }
 0x294   : > { %s2419_s14 = smov %s2422_s17  ;;  %s2420_s15 = smov %s2426_s18 }
 0x295   :  { %12 = sbr.rel (!%p10_p8) target bundleno = 3 (0x3), region = 68 }

</bundles_post_ra>
